<compile_context>
chip_gen: v7x
topology: tpu7x:2x2x1
jax: 0.10.0
libtpu: 0.0.40
codegen_flags: <defaults>
</compile_context>

<pallas_src>
import jax
import jax.numpy as jnp
from jax import lax
from jax.experimental import pallas as pl
from jax.experimental.pallas import tpu as pltpu

EPS = 1e-5          # PyTorch InstanceNorm2d default
NEG_SLOPE = 0.2     # LeakyReLU slope


def _round_up(x, m):
    return (x + m - 1) // m * m


def _make_kernel(Cout, KQ, Wq, PT, nPT, inv_count):
    """Fused (folded-tap conv matmul) + instance-norm + LeakyReLU kernel body."""

    def kernel(x_ref, w_ref, g_ref, b_ref, m_ref, o_ref, s1_ref, s2_ref):
        # x_ref: (1, 1, SSC_pad, PT+EXTRA) bf16   per-tile input window (+halo)
        # w_ref: (Cpad, KQ*KQ*SSC_pad)     bf16   lane-dense folded weight matrix
        # g_ref/b_ref: (Cout, 1)           f32    gamma / beta
        # m_ref: (1, PT)                   f32    valid-column mask for this tile
        # o_ref: (1, nPT, Cout, PT)        bf16   VMEM-resident output block
        # s1_ref/s2_ref: (Cpad, 1)         f32    running sum / sum-of-squares
        pt = pl.program_id(1)

        @pl.when(pt == 0)
        def _init():
            s1_ref[...] = jnp.zeros_like(s1_ref)
            s2_ref[...] = jnp.zeros_like(s2_ref)

        # Shifted-window im2col for this tile: KQ*KQ statically lane-shifted,
        # full-height (sublane-tile aligned) slices stacked on the contraction
        # axis.  Built once; feeds a single MXU matmul.
        parts = []
        for qi in range(KQ):
            for qj in range(KQ):
                off = qi * Wq + qj
                parts.append(x_ref[0, 0, :, off:off + PT])
        xcol = jnp.concatenate(parts, axis=0)                  # (KQ*KQ*SSC_pad, PT)

        # Single folded matmul: contraction = K*K*Cin (padded), f32 accumulation.
        conv = jnp.dot(w_ref[...], xcol,
                       preferred_element_type=jnp.float32)     # (Cpad, PT) f32

        # Running per-channel statistics over valid output positions only.
        # TODO(synk): switch to centered / pilot-subtracted accumulation if
        # E[x^2]-E[x]^2 cancellation ever matters at production magnitudes.
        cm = conv * m_ref[...]
        s1_ref[...] += jnp.sum(cm, axis=1, keepdims=True)
        s2_ref[...] += jnp.sum(cm * conv, axis=1, keepdims=True)

        # Stash the raw conv tile (bf16) into the VMEM-resident output block
        # (dynamic index only on the untiled tile axis).
        o_ref[0, pt, :, :] = conv[0:Cout, :].astype(o_ref.dtype)

        # Finalize on the last spatial tile: instance-norm + LeakyReLU in place.
        @pl.when(pt == nPT - 1)
        def _finalize():
            mean = s1_ref[0:Cout, :] * inv_count                # (Cout, 1)
            var = jnp.maximum(s2_ref[0:Cout, :] * inv_count - mean * mean, 0.0)
            g = g_ref[...] * lax.rsqrt(var + EPS)               # EUP rsqrt
            shift = (b_ref[...] - mean * g).reshape(1, Cout, 1)
            g = g.reshape(1, Cout, 1)
            y = o_ref[0].astype(jnp.float32) * g + shift        # (nPT, Cout, PT)
            y = jnp.where(y >= 0, y, NEG_SLOPE * y)             # LeakyReLU(0.2)
            o_ref[0] = y.astype(o_ref.dtype)

    return kernel


def cnn_block_forward(x, weight, gamma, beta, stride, max_tile_cols=2048):
    """x: (N, Cin, H, W) f32 NCHW; weight: (Cout, Cin, 4, 4); gamma/beta: (Cout,)."""
    N, Cin, H, W = x.shape
    Cout, _, K, _ = weight.shape
    s = int(stride)
    # TODO(synk): strides that do not divide kernel_size need uneven phase kernels.
    assert K % s == 0, "stride must divide kernel_size"
    KQ = K // s

    # Reflect pad by 1 (PyTorch padding_mode='reflect').
    xp = jnp.pad(x, ((0, 0), (0, 0), (1, 1), (1, 1)), mode="reflect")
    Hp, Wp = H + 2, W + 2
    OH = (Hp - K) // s + 1
    OW = (Wp - K) // s + 1

    # Space-to-depth phase decomposition: stride-s conv -> s*s stride-1 sub-convs.
    Hp_pad, Wp_pad = _round_up(Hp, s), _round_up(Wp, s)
    xp = jnp.pad(xp, ((0, 0), (0, 0), (0, Hp_pad - Hp), (0, Wp_pad - Wp)))
    Hq, Wq = Hp_pad // s, Wp_pad // s
    xps = xp.reshape(N, Cin, Hq, s, Wq, s).transpose(0, 3, 5, 1, 2, 4)  # (N,a,b,C,Hq,Wq)
    SSC = s * s * Cin
    SSC_pad = _round_up(SSC, 16)          # bf16 sublane tile -> aligned im2col concat
    xflat = xps.reshape(N, SSC, Hq * Wq).astype(jnp.bfloat16)
    xflat = jnp.pad(xflat, ((0, 0), (0, SSC_pad - SSC), (0, 0)))

    # Flattened-window geometry: output position p = oh*Wq + ow (ow < OW valid);
    # tap (qi, qj) reads column p + qi*Wq + qj.
    PW = OH * Wq
    PW_pad = _round_up(PW, 128)

    # Spatial tile size: multiple of 128 lanes dividing PW_pad, capped.
    n_lanes = PW_pad // 128
    max_t = max(1, int(max_tile_cols) // 128)
    t = 1
    for cand in range(1, max_t + 1):
        if n_lanes % cand == 0:
            t = cand
    PT = 128 * t
    nPT = PW_pad // PT

    off_max = (KQ - 1) * Wq + (KQ - 1)
    EXTRA = _round_up(off_max, 128)       # static halo -> all in-kernel offsets static
    L_pad = max(PW_pad + EXTRA, _round_up(Hq * Wq, 128))
    xflat = jnp.pad(xflat, ((0, 0), (0, 0), (0, L_pad - Hq * Wq)))

    # Per-tile input windows (tile + halo): ~(1 + EXTRA/PT)x input bytes.
    x_tiles = jnp.stack(
        [xflat[:, :, p * PT: p * PT + PT + EXTRA] for p in range(nPT)], axis=1)
    # (N, nPT, SSC_pad, PT+EXTRA)

    # Lane-dense folded weights: (Cpad, KQ*KQ*SSC_pad); column index
    #   (qi*KQ + qj)*SSC_pad + (a*s + b)*Cin + c   -- matches the in-kernel im2col.
    Cpad = _round_up(Cout, 16)            # bf16 sublane requirement, not 128
    wt = weight.astype(jnp.float32).reshape(Cout, Cin, KQ, s, KQ, s)
    wt = wt.transpose(0, 2, 4, 3, 5, 1).reshape(Cout, KQ * KQ, SSC)
    wt = jnp.pad(wt, ((0, Cpad - Cout), (0, 0), (0, SSC_pad - SSC)))
    TC = KQ * KQ * SSC_pad
    wt = wt.reshape(Cpad, TC).astype(jnp.bfloat16)

    gamma2 = gamma.reshape(Cout, 1).astype(jnp.float32)
    beta2 = beta.reshape(Cout, 1).astype(jnp.float32)

    col = jnp.arange(PW_pad, dtype=jnp.int32)
    mask = ((col < PW) & ((col % Wq) < OW)).astype(jnp.float32).reshape(1, PW_pad)

    kernel = _make_kernel(Cout, KQ, Wq, PT, nPT, 1.0 / float(OH * OW))

    # Generation-aware VMEM budget (v5e/v6e: 128 MiB, v7x: 64 MiB per core).
    est = (2 * SSC_pad * (PT + EXTRA) * 2 + 2 * Cpad * TC * 2
           + 2 * nPT * Cout * PT * 2 + TC * PT * 2 + Cpad * PT * 4
           + 2 * PT * 4 + 8 * Cpad * 4 + 4096)
    try:
        vmem_cap = int(pltpu.get_tpu_info().vmem_capacity_bytes)
    except Exception:
        vmem_cap = 64 * 1024 * 1024
    vmem_limit = int(min(max(4 * est, 16 * 1024 * 1024), vmem_cap // 2))

    # TODO(synk): for tiny images / small N, pack several images along the lane
    # axis per grid step to amortize per-step overhead and feed both TensorCores.
    out_tiles = pl.pallas_call(
        kernel,
        out_shape=jax.ShapeDtypeStruct((N, nPT, Cout, PT), jnp.bfloat16),
        grid_spec=pltpu.PrefetchScalarGridSpec(
            num_scalar_prefetch=0,
            grid=(N, nPT),
            in_specs=[
                pl.BlockSpec((1, 1, SSC_pad, PT + EXTRA), lambda n, p: (n, p, 0, 0)),
                pl.BlockSpec((Cpad, TC), lambda n, p: (0, 0)),
                pl.BlockSpec((Cout, 1), lambda n, p: (0, 0)),
                pl.BlockSpec((Cout, 1), lambda n, p: (0, 0)),
                pl.BlockSpec((1, PT), lambda n, p: (0, p)),
            ],
            out_specs=pl.BlockSpec((1, nPT, Cout, PT), lambda n, p: (n, 0, 0, 0)),
            scratch_shapes=[pltpu.VMEM((Cpad, 1), jnp.float32),
                            pltpu.VMEM((Cpad, 1), jnp.float32)],
        ),
        compiler_params=pltpu.CompilerParams(
            dimension_semantics=("parallel", "arbitrary"),
            vmem_limit_bytes=vmem_limit,
        ),
        cost_estimate=pl.CostEstimate(
            flops=2 * N * Cout * Cin * K * K * OH * OW,
            transcendentals=N * Cout,
            bytes_accessed=int(x_tiles.size * 2 + wt.size * 2
                               + N * nPT * Cout * PT * 2),
        ),
    )(x_tiles, wt, gamma2, beta2, mask)

    # (N, nPT, Cout, PT) -> NCHW.  nPT == 1: free reshape; nPT > 1: cheap
    # major-axis shuffle (chosen so the kernel never needs dynamic lane stores).
    out = out_tiles.transpose(0, 2, 1, 3).reshape(N, Cout, PW_pad)
    out = out[:, :, :PW].reshape(N, Cout, OH, Wq)[:, :, :, :OW]
    return out.astype(jnp.float32)


def _reference(x, weight, gamma, beta, stride):
    """Pure-JAX reference matching PyTorch semantics."""
    xp = jnp.pad(x, ((0, 0), (0, 0), (1, 1), (1, 1)), mode="reflect")
    conv = lax.conv_general_dilated(
        xp, weight, window_strides=(stride, stride), padding="VALID",
        dimension_numbers=("NCHW", "OIHW", "NCHW"),
        precision=lax.Precision.HIGHEST)
    mean = jnp.mean(conv, axis=(2, 3), keepdims=True)
    var = jnp.mean((conv - mean) ** 2, axis=(2, 3), keepdims=True)
    xhat = (conv - mean) * lax.rsqrt(var + EPS)
    y = xhat * gamma.reshape(1, -1, 1, 1) + beta.reshape(1, -1, 1, 1)
    return jnp.where(y >= 0, y, NEG_SLOPE * y)


if __name__ == "__main__":
    key = jax.random.PRNGKey(0)
    k_x, k_w, k_g, k_b = jax.random.split(key, 4)

    N, Cin, H, W = 2, 4, 16, 16
    Cout, K = 8, 4

    x = jax.random.normal(k_x, (N, Cin, H, W), dtype=jnp.float32)
    weight = jax.random.normal(k_w, (Cout, Cin, K, K), dtype=jnp.float32) * 0.1
    gamma = 1.0 + 0.1 * jax.random.normal(k_g, (Cout,), dtype=jnp.float32)
    beta = 0.1 * jax.random.normal(k_b, (Cout,), dtype=jnp.float32)

    fwd = jax.jit(cnn_block_forward, static_argnums=(4, 5))

    # Reference with bf16-rounded conv operands (the kernel deliberately feeds the
    # MXU bf16 operands with f32 accumulation); norm/activation math stays f32,
    # final output is bf16 -> tolerance reflects bf16 rounding only.
    x_q = x.astype(jnp.bfloat16).astype(jnp.float32)
    w_q = weight.astype(jnp.bfloat16).astype(jnp.float32)

    # (stride, spatial-tile cap): stride 2 and 1, plus a forced multi-tile run to
    # exercise the carried-statistics + finalize path.
    for stride, tile_cap in ((2, 2048), (1, 2048), (1, 128)):
        out = jax.block_until_ready(fwd(x, weight, gamma, beta, stride, tile_cap))
        ref = _reference(x_q, w_q, gamma, beta, stride)
        assert out.shape == ref.shape, (stride, out.shape, ref.shape)
        err = float(jnp.max(jnp.abs(out - ref)))
        assert err < 3e-2, (stride, tile_cap, err)

    print("KERNEL_OK")
</pallas_src>

<mosaic_0001>
module attributes {stable_mosaic.version = 11 : i64} {
  func.func @kernel(%arg0: i32, %arg1: i32, %arg2: memref<1x1x16x256xbf16, #tpu.memory_space<vmem>>, %arg3: memref<16x64xbf16, #tpu.memory_space<vmem>>, %arg4: memref<8x1xf32, #tpu.memory_space<vmem>>, %arg5: memref<8x1xf32, #tpu.memory_space<vmem>>, %arg6: memref<1x128xf32, #tpu.memory_space<vmem>>, %arg7: memref<1x1x8x128xbf16, #tpu.memory_space<vmem>>, %arg8: memref<16x1xf32, #tpu.memory_space<vmem>>, %arg9: memref<16x1xf32, #tpu.memory_space<vmem>>) attributes {dimension_semantics = [#tpu.dimension_semantics<parallel>, #tpu.dimension_semantics<arbitrary>], iteration_bounds = array<i64: 2, 1>, scalar_prefetch = 0 : i64, scratch_operands = 2 : i64, tpu.core_type = #tpu.core_type<tc>, window_params = [{transform_indices = @transform_0, window_bounds = array<i64: 1, 1, 16, 256>}, {pipeline_mode = #tpu.pipeline_mode<synchronous>, transform_indices = @transform_1, window_bounds = array<i64: 16, 64>}, {pipeline_mode = #tpu.pipeline_mode<synchronous>, transform_indices = @transform_2, window_bounds = array<i64: 8, 1>}, {pipeline_mode = #tpu.pipeline_mode<synchronous>, transform_indices = @transform_3, window_bounds = array<i64: 8, 1>}, {transform_indices = @transform_4, window_bounds = array<i64: 1, 128>}, {transform_indices = @transform_5, window_bounds = array<i64: 1, 1, 8, 128>}]} {
    %c0_i32 = arith.constant 0 : i32
    %0 = arith.cmpi eq, %arg1, %c0_i32 : i32
    %1 = arith.extui %0 : i1 to i32
    %c0_i32_0 = arith.constant 0 : i32
    %2 = arith.cmpi ne, %1, %c0_i32_0 : i32
    scf.if %2 {
      %cst_32 = arith.constant 0.000000e+00 : f32
      %37 = vector.broadcast %cst_32 : f32 to vector<16x1xf32>
      %c0_33 = arith.constant 0 : index
      %c0_34 = arith.constant 0 : index
      %38 = vector.load %arg8[%c0_33, %c0_34] : memref<16x1xf32, #tpu.memory_space<vmem>>, vector<16x1xf32>
      tpu.vector_store %arg8[%c0_33, %c0_34], %37 {strides = array<i32>} : memref<16x1xf32, #tpu.memory_space<vmem>>, vector<16x1xf32>,
      %cst_35 = arith.constant 0.000000e+00 : f32
      %39 = vector.broadcast %cst_35 : f32 to vector<16x1xf32>
      %c0_36 = arith.constant 0 : index
      %c0_37 = arith.constant 0 : index
      %40 = vector.load %arg9[%c0_36, %c0_37] : memref<16x1xf32, #tpu.memory_space<vmem>>, vector<16x1xf32>
      tpu.vector_store %arg9[%c0_36, %c0_37], %39 {strides = array<i32>} : memref<16x1xf32, #tpu.memory_space<vmem>>, vector<16x1xf32>,
    } else {
    }
    %c0 = arith.constant 0 : index
    %c0_1 = arith.constant 0 : index
    %c0_2 = arith.constant 0 : index
    %c0_3 = arith.constant 0 : index
    %3 = vector.load %arg2[%c0, %c0_1, %c0_2, %c0_3] : memref<1x1x16x256xbf16, #tpu.memory_space<vmem>>, vector<1x1x16x128xbf16>
    %4 = vector.shape_cast %3 : vector<1x1x16x128xbf16> to vector<16x128xbf16>
    %c0_4 = arith.constant 0 : index
    %c0_5 = arith.constant 0 : index
    %c0_6 = arith.constant 0 : index
    %c1 = arith.constant 1 : index
    %5 = vector.load %arg2[%c0_4, %c0_5, %c0_6, %c1] : memref<1x1x16x256xbf16, #tpu.memory_space<vmem>>, vector<1x1x16x128xbf16>
    %6 = vector.shape_cast %5 : vector<1x1x16x128xbf16> to vector<16x128xbf16>
    %c0_7 = arith.constant 0 : index
    %c0_8 = arith.constant 0 : index
    %c0_9 = arith.constant 0 : index
    %c9 = arith.constant 9 : index
    %7 = vector.load %arg2[%c0_7, %c0_8, %c0_9, %c9] : memref<1x1x16x256xbf16, #tpu.memory_space<vmem>>, vector<1x1x16x128xbf16>
    %8 = vector.shape_cast %7 : vector<1x1x16x128xbf16> to vector<16x128xbf16>
    %c0_10 = arith.constant 0 : index
    %c0_11 = arith.constant 0 : index
    %c0_12 = arith.constant 0 : index
    %c10 = arith.constant 10 : index
    %9 = vector.load %arg2[%c0_10, %c0_11, %c0_12, %c10] : memref<1x1x16x256xbf16, #tpu.memory_space<vmem>>, vector<1x1x16x128xbf16>
    %10 = vector.shape_cast %9 : vector<1x1x16x128xbf16> to vector<16x128xbf16>
    %11 = tpu.concatenate %4, %6, %8, %10 in 0 : vector<16x128xbf16>, vector<16x128xbf16>, vector<16x128xbf16>, vector<16x128xbf16> -> vector<64x128xbf16>
    %c0_13 = arith.constant 0 : index
    %c0_14 = arith.constant 0 : index
    %12 = vector.load %arg3[%c0_13, %c0_14] : memref<16x64xbf16, #tpu.memory_space<vmem>>, vector<16x64xbf16>
    %cst = arith.constant dense<0.000000e+00> : vector<16x128xf32>
    %13 = tpu.matmul %12, %11, %cst {dimension_numbers = #tpu.dot_dimension_numbers<[1], [0], [0], [1], [0, 0, 1, 1], [], []>} : vector<16x64xbf16>, vector<64x128xbf16>, vector<16x128xf32> -> vector<16x128xf32>
    %c0_15 = arith.constant 0 : index
    %c0_16 = arith.constant 0 : index
    %14 = vector.load %arg6[%c0_15, %c0_16] : memref<1x128xf32, #tpu.memory_space<vmem>>, vector<1x128xf32>
    %15 = vector.broadcast %14 : vector<1x128xf32> to vector<16x128xf32>
    %16 = arith.mulf %13, %15 : vector<16x128xf32>
    %c0_17 = arith.constant 0 : index
    %c0_18 = arith.constant 0 : index
    %17 = vector.load %arg8[%c0_17, %c0_18] : memref<16x1xf32, #tpu.memory_space<vmem>>, vector<16x1xf32>
    %cst_19 = arith.constant dense<0.000000e+00> : vector<16xf32>
    %18 = vector.multi_reduction <add>, %16, %cst_19 [1] : vector<16x128xf32> to vector<16xf32>
    %19 = vector.shape_cast %18 : vector<16xf32> to vector<16x1xf32>
    %20 = arith.addf %17, %19 : vector<16x1xf32>
    %c0_20 = arith.constant 0 : index
    %c0_21 = arith.constant 0 : index
    %21 = vector.load %arg8[%c0_20, %c0_21] : memref<16x1xf32, #tpu.memory_space<vmem>>, vector<16x1xf32>
    tpu.vector_store %arg8[%c0_20, %c0_21], %20 {strides = array<i32>} : memref<16x1xf32, #tpu.memory_space<vmem>>, vector<16x1xf32>,
    %c0_22 = arith.constant 0 : index
    %c0_23 = arith.constant 0 : index
    %22 = vector.load %arg9[%c0_22, %c0_23] : memref<16x1xf32, #tpu.memory_space<vmem>>, vector<16x1xf32>
    %23 = arith.mulf %16, %13 : vector<16x128xf32>
    %cst_24 = arith.constant dense<0.000000e+00> : vector<16xf32>
    %24 = vector.multi_reduction <add>, %23, %cst_24 [1] : vector<16x128xf32> to vector<16xf32>
    %25 = vector.shape_cast %24 : vector<16xf32> to vector<16x1xf32>
    %26 = arith.addf %22, %25 : vector<16x1xf32>
    %c0_25 = arith.constant 0 : index
    %c0_26 = arith.constant 0 : index
    %27 = vector.load %arg9[%c0_25, %c0_26] : memref<16x1xf32, #tpu.memory_space<vmem>>, vector<16x1xf32>
    tpu.vector_store %arg9[%c0_25, %c0_26], %26 {strides = array<i32>} : memref<16x1xf32, #tpu.memory_space<vmem>>, vector<16x1xf32>,
    %28 = vector.extract_strided_slice %13 {offsets = [0, 0], sizes = [8, 128], strides = [1, 1]} : vector<16x128xf32> to vector<8x128xf32>
    %29 = arith.truncf %28 : vector<8x128xf32> to vector<8x128xbf16>
    %c0_27 = arith.constant 0 : index
    %30 = arith.index_cast %arg1 : i32 to index
    %c0_28 = arith.constant 0 : index
    %c0_29 = arith.constant 0 : index
    %31 = vector.load %arg7[%c0_27, %30, %c0_28, %c0_29] : memref<1x1x8x128xbf16, #tpu.memory_space<vmem>>, vector<1x1x8x128xbf16>
    %32 = vector.shape_cast %31 : vector<1x1x8x128xbf16> to vector<8x128xbf16>
    %33 = vector.shape_cast %29 : vector<8x128xbf16> to vector<1x1x8x128xbf16>
    tpu.vector_store %arg7[%c0_27, %30, %c0_28, %c0_29], %33 {strides = array<i32>} : memref<1x1x8x128xbf16, #tpu.memory_space<vmem>>, vector<1x1x8x128xbf16>,
    %c0_i32_30 = arith.constant 0 : i32
    %34 = arith.cmpi eq, %arg1, %c0_i32_30 : i32
    %35 = arith.extui %34 : i1 to i32
    %c0_i32_31 = arith.constant 0 : i32
    %36 = arith.cmpi ne, %35, %c0_i32_31 : i32
    scf.if %36 {
      %c0_32 = arith.constant 0 : index
      %c0_33 = arith.constant 0 : index
      %37 = vector.load %arg8[%c0_32, %c0_33] : memref<16x1xf32, #tpu.memory_space<vmem>>, vector<8x1xf32>
      %cst_34 = arith.constant 1.562500e-02 : f32
      %38 = vector.broadcast %cst_34 : f32 to vector<8x1xf32>
      %39 = arith.mulf %37, %38 : vector<8x1xf32>
      %c0_35 = arith.constant 0 : index
      %c0_36 = arith.constant 0 : index
      %40 = vector.load %arg9[%c0_35, %c0_36] : memref<16x1xf32, #tpu.memory_space<vmem>>, vector<8x1xf32>
      %cst_37 = arith.constant 1.562500e-02 : f32
      %41 = vector.broadcast %cst_37 : f32 to vector<8x1xf32>
      %42 = arith.mulf %40, %41 : vector<8x1xf32>
      %43 = arith.mulf %39, %39 : vector<8x1xf32>
      %44 = arith.subf %42, %43 : vector<8x1xf32>
      %cst_38 = arith.constant 0.000000e+00 : f32
      %45 = vector.broadcast %cst_38 : f32 to vector<8x1xf32>
      %46 = arith.maximumf %44, %45 : vector<8x1xf32>
      %c0_39 = arith.constant 0 : index
      %c0_40 = arith.constant 0 : index
      %47 = vector.load %arg4[%c0_39, %c0_40] : memref<8x1xf32, #tpu.memory_space<vmem>>, vector<8x1xf32>
      %cst_41 = arith.constant 9.99999974E-6 : f32
      %48 = vector.broadcast %cst_41 : f32 to vector<8x1xf32>
      %49 = arith.addf %46, %48 : vector<8x1xf32>
      %50 = math.rsqrt %49 : vector<8x1xf32>
      %51 = arith.mulf %47, %50 : vector<8x1xf32>
      %c0_42 = arith.constant 0 : index
      %c0_43 = arith.constant 0 : index
      %52 = vector.load %arg5[%c0_42, %c0_43] : memref<8x1xf32, #tpu.memory_space<vmem>>, vector<8x1xf32>
      %53 = arith.mulf %39, %51 : vector<8x1xf32>
      %54 = arith.subf %52, %53 : vector<8x1xf32>
      %55 = vector.shape_cast %54 : vector<8x1xf32> to vector<1x8x1xf32>
      %56 = vector.shape_cast %51 : vector<8x1xf32> to vector<1x8x1xf32>
      %c0_44 = arith.constant 0 : index
      %c0_45 = arith.constant 0 : index
      %c0_46 = arith.constant 0 : index
      %c0_47 = arith.constant 0 : index
      %57 = vector.load %arg7[%c0_44, %c0_45, %c0_46, %c0_47] : memref<1x1x8x128xbf16, #tpu.memory_space<vmem>>, vector<1x1x8x128xbf16>
      %58 = vector.shape_cast %57 : vector<1x1x8x128xbf16> to vector<1x8x128xbf16>
      %59 = arith.extf %58 : vector<1x8x128xbf16> to vector<1x8x128xf32>
      %60 = vector.broadcast %56 : vector<1x8x1xf32> to vector<1x8x128xf32>
      %61 = arith.mulf %59, %60 : vector<1x8x128xf32>
      %62 = vector.broadcast %55 : vector<1x8x1xf32> to vector<1x8x128xf32>
      %63 = arith.addf %61, %62 : vector<1x8x128xf32>
      %cst_48 = arith.constant 0.000000e+00 : f32
      %64 = vector.broadcast %cst_48 : f32 to vector<1x8x128xf32>
      %65 = arith.cmpf oge, %63, %64 : vector<1x8x128xf32>
      %cst_49 = arith.constant 2.000000e-01 : f32
      %66 = vector.broadcast %cst_49 : f32 to vector<1x8x128xf32>
      %67 = arith.mulf %66, %63 : vector<1x8x128xf32>
      %68 = arith.select %65, %63, %67 : vector<1x8x128xi1>, vector<1x8x128xf32>
      %69 = arith.truncf %68 : vector<1x8x128xf32> to vector<1x8x128xbf16>
      %c0_50 = arith.constant 0 : index
      %c0_51 = arith.constant 0 : index
      %c0_52 = arith.constant 0 : index
      %c0_53 = arith.constant 0 : index
      %70 = vector.load %arg7[%c0_50, %c0_51, %c0_52, %c0_53] : memref<1x1x8x128xbf16, #tpu.memory_space<vmem>>, vector<1x1x8x128xbf16>
      %71 = vector.shape_cast %70 : vector<1x1x8x128xbf16> to vector<1x8x128xbf16>
      %72 = vector.shape_cast %69 : vector<1x8x128xbf16> to vector<1x1x8x128xbf16>
      tpu.vector_store %arg7[%c0_50, %c0_51, %c0_52, %c0_53], %72 {strides = array<i32>} : memref<1x1x8x128xbf16, #tpu.memory_space<vmem>>, vector<1x1x8x128xbf16>,
    } else {
    }
    return
  }
  func.func @transform_0(%arg0: i32, %arg1: i32) -> (i32, i32, i32, i32) {
    %c0_i32 = arith.constant 0 : i32
    %c0_i32_0 = arith.constant 0 : i32
    %c0_i32_1 = arith.constant 0 : i32
    return %arg0, %arg1, %c0_i32, %c0_i32_0 : i32, i32, i32, i32
  }
  func.func @transform_1(%arg0: i32, %arg1: i32) -> (i32, i32) {
    %c0_i32 = arith.constant 0 : i32
    %c0_i32_0 = arith.constant 0 : i32
    %c0_i32_1 = arith.constant 0 : i32
    return %c0_i32, %c0_i32_0 : i32, i32
  }
  func.func @transform_2(%arg0: i32, %arg1: i32) -> (i32, i32) {
    %c0_i32 = arith.constant 0 : i32
    %c0_i32_0 = arith.constant 0 : i32
    %c0_i32_1 = arith.constant 0 : i32
    return %c0_i32, %c0_i32_0 : i32, i32
  }
  func.func @transform_3(%arg0: i32, %arg1: i32) -> (i32, i32) {
    %c0_i32 = arith.constant 0 : i32
    %c0_i32_0 = arith.constant 0 : i32
    %c0_i32_1 = arith.constant 0 : i32
    return %c0_i32, %c0_i32_0 : i32, i32
  }
  func.func @transform_4(%arg0: i32, %arg1: i32) -> (i32, i32) {
    %c0_i32 = arith.constant 0 : i32
    %c0_i32_0 = arith.constant 0 : i32
    return %c0_i32, %arg1 : i32, i32
  }
  func.func @transform_5(%arg0: i32, %arg1: i32) -> (i32, i32, i32, i32) {
    %c0_i32 = arith.constant 0 : i32
    %c0_i32_0 = arith.constant 0 : i32
    %c0_i32_1 = arith.constant 0 : i32
    %c0_i32_2 = arith.constant 0 : i32
    return %arg0, %c0_i32, %c0_i32_0, %c0_i32_1 : i32, i32, i32, i32
  }
}

</mosaic_0001>

<bundles_post_ra>
// kernel: cnn_block_forward.1
= control target key start
LH: loop header
LB: loop body
LE: loop exit
PB: predicated region body
PF: predicated region fallthrough
CT: control target
= control target key end

     0   :  { %s655_s18 = smov 0   ;;  %s657_s19 = smov 0   ;;  %s717_s0 = inlined_call_operand.vmem [shape: bf16[2,1,16,256], index: 0, kind: input, shape index: {}]   ;;  %s718_s1 = inlined_call_operand.vmem [shape: bf16[16,64], index: 1, kind: input, shape index: {}]   ;;  %s719_s2 = inlined_call_operand.vmem [shape: f32[8,1], index: 2, kind: input, shape index: {}]   ;;  %s720_s3 = inlined_call_operand.vmem [shape: f32[8,1], index: 3, kind: input, shape index: {}]   ;;  %s721_s4 = inlined_call_operand.vmem [shape: f32[1,128], index: 4, kind: input, shape index: {}]   ;;  %s722_s5 = inlined_call_operand.vmem [shape: bf16[2,1,8,128], index: 5, kind: output, shape index: {}]  }
   0x1   :  { %s659_s20 = smov 0  }
   0x2 LB: > { %s27_s21 = sadd.s32 1, %s613_s19  ;;  %p526_p0 = scmp.ge.s32.totalorder %s617_s20, 1  ;;  %s617_s20 = sphi %s659_s20, %s15_s20   ;;  %s613_s19 = sphi %s657_s19, %s724_s19   ;;  %s609_s18 = sphi %s655_s18, %s723_s18  }
   0x3   : > { %p29_p1 = scmp.ge.s32.totalorder %s27_s21, 2  ;;  %p213_p2 = scmp.lt.s32.totalorder %s617_s20, 3 }
   0x5   : > { %s726_s21 = smov (%p29_p1, %s27_s21), 0  ;;  %p214_p3 = pnand %p526_p0, %p213_p2 }
   0x6   : > { %p247_p4 = scmp.lt.s32.totalorder (!%p214_p3), %s609_s18, 1  ;;  %v619_v0 = vmov (!%p214_p3), 0.0   ;;  %s620_s26 = smov (!%p214_p3), 119   ;;  %vm622_vm0 = vmmov (!%p214_p3), 0   ;;  %vm295_vm1 = vcmask (!%p214_p3), 1039360   ;;  %vm302_vm2 = vcmask (!%p214_p3), 973824  }
   0x7   : > { %217 = sbr.rel (%p214_p3) target bundleno = 678 (0x2a6), region = 40  ;;  %544 = vmatprep.subr.bf16.mxu0 (!%p214_p3), %v619_v0  ;;  %s621_s27 = smov (!%p214_p3), 127   ;;  %552 = vmatprep.mubr.msk.bf16.mxu0 (!%p214_p3), %vm622_vm0, %v619_v0  ;;  %vm309_vm3 = vcmask (!%p214_p3), 965632   ;;  %v592_v13 = vld [vmem:[%s718_s1] sm:$0xff] (!%p214_p3)   ;;  %vm319_vm4 = vcmask (!%p214_p3), 523264   ;;  %vm268_vm5 = vcmask (!%p214_p3), 7168  }
   0x8   : > { %s623_s28 = smov (!%p214_p3), 118   ;;  %269 = vst.msk [vmem:[#allocation2] sm:$0xff] (!%p214_p3), %vm268_vm5, %v619_v0  ;;  %270 = vst.msk [vmem:[#allocation2 + $0x8] sm:$0xff] (!%p214_p3), %vm268_vm5, %v619_v0  ;;  %v535_v14 = vld [vmem:[%s721_s4] ss:$0 sm:$0xff] (!%p214_p3)  ;;  %v624_v24 = vmov (!%p214_p3), 0  }
   0x9   : > { %271 = vst.msk [vmem:[#allocation3] sm:$0xff] (!%p214_p3), %vm268_vm5, %v619_v0  ;;  %272 = vst.msk [vmem:[#allocation3 + $0x8] sm:$0xff] (!%p214_p3), %vm268_vm5, %v619_v0  ;;  %586 = vset.pattern.permute.xlu1 (!%p214_p3), %v624_v24  ;;  %587 = vset.pattern.permute.xlu0 (!%p214_p3), %v624_v24  ;;  %v410_v45 = vld [vmem:[%s719_s2] sm:$0xff] (!%p214_p3) }
   0xa   : > { %v414_v48 = vld [vmem:[%s720_s3] sm:$0xff] (!%p214_p3) }
   0xe   : > { %s728_s18 = smov (!%p247_p4, %s609_s18), 1 }
   0xf   : > { %s538_s22 = sshll.u32 %s728_s18, 4  ;;  %s529_s6 = sshll.u32 %s728_s18, 2  ;;  %v373_v25 = vld [vmem:[#allocation2] sm:$0xff]  ;;  %v374_v30 = vld [vmem:[#allocation2 + $0x8] sm:$0xff] }
  0x10   : > { %s255_s25 = scalar_lea.vmem %s717_s0, %s538_s22  ;;  %s693_s11 = scalar_lea.vmem %s722_s5, %s529_s6  ;;  %v384_v27 = vld [vmem:[#allocation3] sm:$0xff]  ;;  %v385_v34 = vld [vmem:[#allocation3 + $0x8] sm:$0xff] }
  0x11   : > { %v588_v1 = vld [vmem:[%s255_s25] ss:$8 sps:$4 sm:$0xff]   ;;  %v590_v2 = vld [vmem:[%s255_s25 + $0x4] ss:$8 sps:$4 sm:$0xff]  }
  0x12   : > { %298 = vrot.lane.b32.xlu1 %v588_v1, %s620_s26  ;;  %291 = vrot.lane.b32.xlu0 %v588_v1, %s621_s27  ;;  %v591_v3 = vld [vmem:[%s255_s25] ss:$8 sps:$4 sm:$0xff]  }
  0x13   : > { %545 = vmatpush3.bf16.msra.mxu0 %v591_v3 }
  0x14   : > { %546 = vmatprep.subr.bf16.mxu0 %v619_v0 }
  0x16   : > { %300 = vrot.lane.b32.xlu1 %v590_v2, %s620_s26  ;;  %293 = vrot.lane.b32.xlu0 %v590_v2, %s621_s27 }
  0x1a   : > { %307 = vrot.lane.b32.xlu1 %v590_v2, %s623_s28  ;;  %305 = vrot.lane.b32.xlu0 %v588_v1, %s623_s28 }
  0x84   : > { %v299_v4 = vpop.permute.xlu1 %298  ;;  %v292_v5 = vpop.permute.xlu0 %291 }
  0x88   : > { %v301_v6 = vpop.permute.xlu1 %300  ;;  %v294_v7 = vpop.permute.xlu0 %293 }
  0x89   : > { %v296_v8 = vsel %vm295_vm1, %v292_v5, %v294_v7  ;;  %v303_v11 = vsel %vm302_vm2, %v299_v4, %v301_v6 }
  0x8a   : > { %547 = vmatpush3.bf16.msra.mxu0 %v296_v8 }
  0x8b   : > { %548 = vmatprep.subr.bf16.mxu0 %v619_v0 }
  0x8c   : > { %v308_v9 = vpop.permute.xlu1 %307  ;;  %v306_v10 = vpop.permute.xlu0 %305 }
  0x8d   : > { %v310_v12 = vsel %vm309_vm3, %v306_v10, %v308_v9 }
  0x8e   : > { %549 = vmatpush3.bf16.msra.mxu0 %v303_v11 }
  0x8f   : > { %550 = vmatprep.subr.bf16.mxu0 %v619_v0 }
  0x92   : > { %551 = vmatpush3.bf16.msra.mxu0 %v310_v12 }
  0x95   : > { %553 = vmatmul.mubr.msk.bf16.vlgmr.msra.gmra.mrb[0].mxu0 %vm319_vm4, %v592_v13 }
 0x168   : > { %v357_v15 = vpop.f32.mrb[0].mxu0 }
 0x169   : > { %v396_v16 = vpack.c.bf16 %v357_v15, %v357_v15  ;;  %v554_v17 = vpop.f32.mrb[1].mxu0  ;;  %v371_v18 = vmul.f32 %v535_v14, %v357_v15 }
 0x16a   : > { %v360_v19 = vpop.f32.mrb[2].mxu0 }
 0x16b   : > { %399 = vst [vmem:[%s693_s11] sm:$0xf] %v396_v16  ;;  %375 = vadd.xlane.f32.xlu0 %v371_v18  ;;  %v555_v20 = vpop.f32.mrb[3].mxu0  ;;  %v386_v21 = vmul.f32 %v371_v18, %v357_v15  ;;  %v372_v22 = vmul.f32 %v535_v14, %v360_v19 }
 0x16d   : > { %388 = vadd.xlane.f32.xlu1 %v386_v21  ;;  %v387_v23 = vmul.f32 %v372_v22, %v360_v19 }
 0x16f   : > { %377 = vadd.xlane.f32.xlu0 %v372_v22 }
 0x172   : > { %v417_v51 = vld [vmem:[%s693_s11] sm:$0xf] }
 0x173   : > { %390 = vadd.xlane.f32.xlu0 %v387_v23  ;;  %v418_v53 = vunpack.c.l.bf16 %v417_v51 }
 0x1f8   : > { %v376_v26 = vpop.xlane.xlu0 %375 }
 0x1f9   : > { %v379_v28 = vadd.f32 %v376_v26, %v373_v25 }
 0x1fa   : > { %v389_v29 = vpop.xlane.xlu1 %388 }
 0x1fb   : > { %382 = vst.msk [vmem:[#allocation2] sm:$0xff] %vm268_vm5, %v379_v28  ;;  %v392_v31 = vadd.f32 %v389_v29, %v384_v27 }
 0x1fc   : > { %v378_v32 = vpop.xlane.xlu0 %377 }
 0x1fd   : > { %394 = vst.msk [vmem:[#allocation3] sm:$0xff] %vm268_vm5, %v392_v31  ;;  %v380_v33 = vadd.f32 %v378_v32, %v374_v30 }
 0x1ff   : > { %383 = vst.msk [vmem:[#allocation2 + $0x8] sm:$0xff] %vm268_vm5, %v380_v33 }
 0x200   : > { %v391_v35 = vpop.xlane.xlu0 %390 }
 0x201   : > { %v393_v36 = vadd.f32 %v391_v35, %v385_v34 }
 0x202   : > { %v403_v37 = vld [vmem:[#allocation2] sm:$0xff] }
 0x203   : > { %395 = vst.msk [vmem:[#allocation3 + $0x8] sm:$0xff] %vm268_vm5, %v393_v36  ;;  %v404_v38 = vmul.f32 0.015625, %v403_v37 }
 0x204   : > { %v405_v39 = vld [vmem:[#allocation3] sm:$0xff] }
 0x205   : > { %v406_v40 = vmul.f32 0.015625, %v405_v39  ;;  %v407_v41 = vmul.f32 %v404_v38, %v404_v38 }
 0x207   : > { %v408_v42 = vsub.f32 %v406_v40, %v407_v41 }
 0x209   : > { %v409_v43 = vmax.f32 %v408_v42, 0.0 }
 0x20b   : > { %v411_v44 = vadd.f32 1e-05, %v409_v43 }
 0x20d   : > { %593 = vrsqrt.f32 %v411_v44 }
 0x217   : > { %v594_v46 = vpop.eup %593 }
 0x218   : > { %v413_v47 = vmul.f32 %v594_v46, %v410_v45 }
 0x21a   : > { %421 = vperm.xlu1 %586, %v413_v47   ;;  %v415_v49 = vmul.f32 %v413_v47, %v404_v38 }
 0x21c   : > { %v416_v50 = vsub.f32 %v414_v48, %v415_v49 }
 0x21e   : > { %427 = vperm.xlu0 %587, %v416_v50  }
 0x299   : > { %v422_v52 = vpop.permute.xlu1 %421 }
 0x29a   : > { %v424_v54 = vmul.f32 %v422_v52, %v418_v53 }
 0x29d   : > { %v428_v55 = vpop.permute.xlu0 %427 }
 0x29e   : > { %v430_v56 = vadd.f32 %v428_v55, %v424_v54 }
 0x2a0   : > { %vm431_vm6 = vcmp.ge.f32.partialorder %v430_v56, 0.0  ;;  %v432_v57 = vmul.f32 0.2, %v430_v56 }
 0x2a2   : > { %v433_v58 = vsel %vm431_vm6, %v430_v56, %v432_v57 }
 0x2a3   : > { %v434_v59 = vpack.c.bf16 %v433_v58, %v433_v58 }
 0x2a5   : > { %435 = vst [vmem:[%s693_s11] sm:$0xf] %v434_v59 }
 0x2a6 PF: > { %s15_s20 = sadd.s32 1, %s617_s20   ;;  %s723_s18 = smov %s613_s19 }
 0x2a7   : > { %p12_p5 = scmp.ge.s32.totalorder %s15_s20, 4   ;;  %s724_s19 = smov %s726_s21 }
 0x2a9   :  { %14 = sbr.rel (!%p12_p5) target bundleno = 2 (0x2), region = 82 }

</bundles_post_ra>
